<compile_context>
chip_gen: v7x
topology: tpu7x:2x2x1
jax: 0.10.0
libtpu: 0.0.40
codegen_flags: <defaults>
</compile_context>

<pallas_src>
import jax
import jax.numpy as jnp
from jax.experimental import pallas as pl
from jax.experimental.pallas import tpu as pltpu


def _mswd_bary_kernel(x_ref, p_ref, o_ref):
    # back = (X @ wT) @ wT.T folded into a single full-width MXU pass X @ P,
    # P = wT @ wT.T precomputed once in the wrapper.
    x = x_ref[...]                                                    # native dtype -> MXU
    back = jnp.dot(x, p_ref[...], preferred_element_type=jnp.float32)  # (Tn, F) f32
    remaining = x.astype(jnp.float32) - back
    # IdentityDestructor bary: z = Xm, hence z @ wT.T == back (bit-exact reuse; a fitted
    # non-identity bary would instead transform Xm = x @ wT here before projecting back).
    o_ref[...] = (remaining + back).astype(o_ref.dtype)


def _round_up(x, m):
    return ((x + m - 1) // m) * m


def _tensorcores_per_chip():
    # v7x exposes 2 TensorCores per chip (the 'parallel' grid axis is sharded across
    # them); v5e / v6e have one.  Best-effort device_kind check, default to 1.
    try:
        kind = jax.devices()[0].device_kind.lower()
    except Exception:
        return 1
    return 2 if ("v7" in kind or "7x" in kind) else 1


def mswd_bary_forward(X, y, wT, *, max_block_bytes=2 * 1024 * 1024, donate_x=False):
    """Pallas equivalent of MSWDBary(nfeatures, ndim, bary_type).forward(X, y)."""
    del y  # consumed only by the bary destructor; IdentityDestructor ignores it.
    N, F = X.shape
    Fw, K = wT.shape
    assert F == Fw, "wT must be (nfeatures, ndim)"

    # ---- parameters: fold the two narrow (K=ndim) matmuls into one projection -------
    wT32 = wT.astype(jnp.float32)

    # Lane-width guard: keep the feature dim a multiple of 128 so output stores are
    # unmasked vst (no-op for F=128).  Zero feature-padding is exact for this layer.
    F_pad = _round_up(F, 128)
    if F_pad != F:
        X_in = jnp.pad(X, ((0, 0), (0, F_pad - F)))
        wT32 = jnp.pad(wT32, ((0, F_pad - F), (0, 0)))
    else:
        X_in = X
    P = (wT32 @ wT32.T).astype(X.dtype)  # (F_pad, F_pad), resident across grid steps

    # ---- row tiling ------------------------------------------------------------------
    itemsize = jnp.dtype(X.dtype).itemsize
    sublane = max(8, 32 // itemsize)  # 8 f32 / 16 bf16 / 32 int8

    rows_cap = max(
        sublane,
        (max_block_bytes // max(1, F_pad * itemsize)) // sublane * sublane,
    )
    tile_n = int(max(sublane, min(rows_cap, _round_up(N, sublane))))
    steps = pl.cdiv(N, tile_n)

    tcs = _tensorcores_per_chip()
    if tcs > 1 and N > sublane:
        # Keep both TensorCores busy and avoid an odd step count (2-vs-1 imbalance).
        steps = _round_up(max(steps, tcs), tcs)
        tile_n = int(max(sublane, _round_up(pl.cdiv(N, steps), sublane)))
        steps = pl.cdiv(N, tile_n)

    out = pl.pallas_call(
        _mswd_bary_kernel,
        out_shape=jax.ShapeDtypeStruct((N, F_pad), X.dtype),
        grid=(steps,),
        in_specs=[
            pl.BlockSpec((tile_n, F_pad), lambda i: (i, 0)),   # X row tile (ragged last tile OK)
            pl.BlockSpec((F_pad, F_pad), lambda i: (0, 0)),    # P = wT @ wT.T (resident)
        ],
        out_specs=pl.BlockSpec((tile_n, F_pad), lambda i: (i, 0)),
        compiler_params=pltpu.CompilerParams(dimension_semantics=("parallel",)),
        input_output_aliases=({0: 0} if donate_x else {}),
    )(X_in, P)

    return out if F_pad == F else out[:, :F]


if __name__ == "__main__":
    key = jax.random.PRNGKey(0)
    kx, ky, kw = jax.random.split(key, 3)

    # Small IAF-style problem: N samples, nfeatures=128 (lane-dense last dim), ndim=16.
    N, nfeatures, ndim = 256, 128, 16

    X = jax.random.normal(kx, (N, nfeatures), dtype=jnp.float32)
    y = jax.random.randint(ky, (N,), 0, 2, dtype=jnp.int32)  # labels (unused by Identity bary)

    # Parameter init exactly as the PyTorch __init__: sign-fixed QR of a random Gaussian.
    wi = jax.random.normal(kw, (nfeatures, ndim), dtype=jnp.float32)
    Q, R = jnp.linalg.qr(wi)
    wT = Q * jnp.sign(jnp.diag(R))[None, :]

    def ref_forward(Xa, wTa):  # pure-JAX reference (IdentityDestructor bary)
        Xm = Xa @ wTa
        return (Xa - Xm @ wTa.T) + Xm @ wTa.T

    Z = jax.block_until_ready(mswd_bary_forward(X, y, wT))
    ref = ref_forward(X, wT)
    assert Z.shape == X.shape and Z.dtype == X.dtype
    assert bool(jnp.allclose(Z, ref, rtol=1e-4, atol=1e-4)), float(jnp.max(jnp.abs(Z - ref)))
    # With the Identity bary the forward is mathematically X itself (up to rounding).
    assert bool(jnp.allclose(Z, X, rtol=1e-4, atol=1e-4))

    # Ragged row count + multi-step grid (exercises the no-pad cdiv path).
    N2 = 203
    X2 = jax.random.normal(jax.random.PRNGKey(1), (N2, nfeatures), dtype=jnp.float32)
    y2 = jnp.zeros((N2,), jnp.int32)
    Z2 = jax.block_until_ready(mswd_bary_forward(X2, y2, wT, max_block_bytes=64 * 1024))
    assert Z2.shape == X2.shape
    assert bool(jnp.allclose(Z2, ref_forward(X2, wT), rtol=1e-4, atol=1e-4))

    print("KERNEL_OK")
</pallas_src>

<mosaic_0001>
module attributes {stable_mosaic.version = 11 : i64} {
  func.func @_mswd_bary_kernel(%arg0: i32, %arg1: memref<256x128xf32, #tpu.memory_space<vmem>>, %arg2: memref<128x128xf32, #tpu.memory_space<vmem>>, %arg3: memref<256x128xf32, #tpu.memory_space<vmem>>) attributes {dimension_semantics = [#tpu.dimension_semantics<parallel>], iteration_bounds = array<i64: 1>, scalar_prefetch = 0 : i64, scratch_operands = 0 : i64, tpu.core_type = #tpu.core_type<tc>, window_params = [{transform_indices = @transform_0, window_bounds = array<i64: 256, 128>}, {pipeline_mode = #tpu.pipeline_mode<synchronous>, transform_indices = @transform_1, window_bounds = array<i64: 128, 128>}, {transform_indices = @transform_2, window_bounds = array<i64: 256, 128>}]} {
    %c0 = arith.constant 0 : index
    %c0_0 = arith.constant 0 : index
    %0 = vector.load %arg1[%c0, %c0_0] : memref<256x128xf32, #tpu.memory_space<vmem>>, vector<256x128xf32>
    %c0_1 = arith.constant 0 : index
    %c0_2 = arith.constant 0 : index
    %1 = vector.load %arg2[%c0_1, %c0_2] : memref<128x128xf32, #tpu.memory_space<vmem>>, vector<128x128xf32>
    %cst = arith.constant dense<0.000000e+00> : vector<256x128xf32>
    %2 = tpu.matmul %0, %1, %cst {dimension_numbers = #tpu.dot_dimension_numbers<[1], [0], [0], [1], [0, 0, 1, 1], [], []>} : vector<256x128xf32>, vector<128x128xf32>, vector<256x128xf32> -> vector<256x128xf32>
    %3 = arith.subf %0, %2 : vector<256x128xf32>
    %4 = arith.addf %3, %2 : vector<256x128xf32>
    %c0_3 = arith.constant 0 : index
    %c0_4 = arith.constant 0 : index
    %5 = vector.load %arg3[%c0_3, %c0_4] : memref<256x128xf32, #tpu.memory_space<vmem>>, vector<256x128xf32>
    tpu.vector_store %arg3[%c0_3, %c0_4], %4 {strides = array<i32>} : memref<256x128xf32, #tpu.memory_space<vmem>>, vector<256x128xf32>,
    return
  }
  func.func @transform_0(%arg0: i32) -> (i32, i32) {
    %c0_i32 = arith.constant 0 : i32
    %c0_i32_0 = arith.constant 0 : i32
    return %arg0, %c0_i32 : i32, i32
  }
  func.func @transform_1(%arg0: i32) -> (i32, i32) {
    %c0_i32 = arith.constant 0 : i32
    %c0_i32_0 = arith.constant 0 : i32
    %c0_i32_1 = arith.constant 0 : i32
    return %c0_i32, %c0_i32_0 : i32, i32
  }
  func.func @transform_2(%arg0: i32) -> (i32, i32) {
    %c0_i32 = arith.constant 0 : i32
    %c0_i32_0 = arith.constant 0 : i32
    return %arg0, %c0_i32 : i32, i32
  }
}

</mosaic_0001>

<bundles_post_ra>
// kernel: tpu_custom_call.1
= control target key start
LH: loop header
LB: loop body
LE: loop exit
PB: predicated region body
PF: predicated region fallthrough
CT: control target
= control target key end

     0   :  { %7 = vsyncpa [#allocation3], 0  ;;  %s873_s0 = inlined_call_operand.hbm [shape: f32[256,128], index: 0, kind: input, shape index: {}]   ;;  %s874_s1 = inlined_call_operand.hbm [shape: f32[128,128], index: 1, kind: input, shape index: {}]   ;;  %s875_s2 = inlined_call_operand.hbm [shape: f32[256,128], index: 2, kind: output, shape index: {}]  }
   0x1   :  { %8 = vsyncpa [#allocation6], 0 }
   0x2   :  { %9 = vsyncpa [#allocation4], 0  ;;  %s680_s9 = smov [#allocation2]   ;;  %s608_s13 = scalar_lea.hbm %s873_s0, 4096 }
   0x3   :  { %s15_s10 = sshll.u32 %s680_s9, 4  ;;  %p609_p0 = scmp.ne.s32.totalorder %s873_s0, %s608_s13  ;;  %s16_s10 = int_to_ptr.vmem [resolvable:$true] %s15_s10 }
   0x4   :  { %p612_p1 = scmp.lt.u32.totalorder %s608_s13, %s873_s0 }
   0x6   :  { %p614_p2 = pnand %p612_p1, %p609_p0 }
   0x8   :  { %617 = shalt.err (!%p614_p2)
}
   0x9   :  { %s618_s18 = scalar_lea.vmem %s16_s10, 4096  ;;  %p623_p4 = scmp.lt.s32.totalorder %s16_s10, %s16_s10 }
   0xa   :  { %p619_p3 = scmp.ne.s32.totalorder %s16_s10, %s618_s18  ;;  %p624_p5 = scmp.lt.s32.totalorder %s618_s18, %s618_s18 }
   0xc   :  { %p625_p6 = por %p624_p5, %p623_p4 }
   0xe   :  { %p626_p7 = pnand %p625_p6, %p619_p3 }
  0x10   :  { %629 = shalt.err (!%p626_p7)
}
  0x11   :  { %s681_s19 = smov 128   ;;  %s682_s20 = smov 8  }
  0x12   :  { %21 = dma.hbm_to_vmem [thread:$0]  %s873_s0, 4096, %s16_s10, [#allocation3], %s681_s19, %s681_s19, %s682_s20  }
  0x13   :  { %s683_s23 = smov [#allocation5]   ;;  %s630_s27 = scalar_lea.hbm %s874_s1, 2048 }
  0x14   :  { %s27_s24 = sshll.u32 %s683_s23, 4  ;;  %p631_p8 = scmp.ne.s32.totalorder %s874_s1, %s630_s27  ;;  %s28_s24 = int_to_ptr.vmem [resolvable:$true] %s27_s24 }
  0x15   :  { %p634_p9 = scmp.lt.u32.totalorder %s630_s27, %s874_s1 }
  0x17   :  { %p636_p10 = pnand %p634_p9, %p631_p8 }
  0x19   :  { %639 = shalt.err (!%p636_p10)
}
  0x1a   :  { %s640_s4 = scalar_lea.vmem %s28_s24, 2048  ;;  %p645_p12 = scmp.lt.s32.totalorder %s28_s24, %s28_s24 }
  0x1b   :  { %p641_p11 = scmp.ne.s32.totalorder %s28_s24, %s640_s4  ;;  %p646_p13 = scmp.lt.s32.totalorder %s640_s4, %s640_s4 }
  0x1d   :  { %p647_p0 = por %p646_p13, %p645_p12 }
  0x1f   :  { %p648_p1 = pnand %p647_p0, %p641_p11 }
  0x21   :  { %651 = shalt.err (!%p648_p1)
}
  0x22   :  { %33 = dma.hbm_to_vmem [thread:$0]  %s874_s1, 2048, %s28_s24, [#allocation6], %s681_s19, %s681_s19, %s682_s20  }
  0x23   :  { %674 = dma.done.wait [#allocation3], 4096  }
  0x24   :  { %675 = vsyncadd [#allocation3], 4294963200 }
  0x25   :  { %676 = dma.done.wait [#allocation6], 2048  }
  0x26   :  { %677 = vsyncadd [#allocation6], 4294965248  ;;  %v72_v0 = vld [vmem:[#allocation5] sm:$0xff]  ;;  %v73_v1 = vld [vmem:[#allocation5 + $0x8] sm:$0xff]  ;;  %s684_s1 = smov [#allocation7]  }
  0x27   :  { %v74_v2 = vld [vmem:[#allocation5 + $0x10] sm:$0xff]  ;;  %v555_v3 = vpack.c.bf16 %v73_v1, %v72_v0  ;;  %v75_v4 = vld [vmem:[#allocation5 + $0x18] sm:$0xff]  ;;  %v76_v6 = vld [vmem:[#allocation5 + $0x20] sm:$0xff]  ;;  %s414_s6 = sshll.u32 %s684_s1, 4  ;;  %s415_s6 = int_to_ptr.vmem [resolvable:$true] %s414_s6 }
  0x28   :  { %v559_v5 = vpack.c.bf16 %v75_v4, %v74_v2  ;;  %v77_v7 = vld [vmem:[#allocation5 + $0x28] sm:$0xff]  ;;  %v730_v9 = vld [vmem:[#allocation2] sm:$0xff]  ;;  %v78_v11 = vld [vmem:[#allocation5 + $0x30] sm:$0xff]  ;;  %s652_s7 = scalar_lea.vmem %s415_s6, 4096  ;;  %p657_p3 = scmp.lt.s32.totalorder %s415_s6, %s415_s6 }
  0x29   :  { %556 = vmatprep.subr.bf16.mxu0 %v555_v3  ;;  %587 = vmatprep.subr.bf16.mxu1 %v555_v3  ;;  %v563_v8 = vpack.c.bf16 %v77_v7, %v76_v6  ;;  %v732_v10 = vld [vmem:[#allocation2 + $0x80] sm:$0xff]  ;;  %v79_v12 = vld [vmem:[#allocation5 + $0x38] sm:$0xff]  ;;  %v81_v15 = vld [vmem:[#allocation5 + $0x48] sm:$0xff]  ;;  %p653_p2 = scmp.ne.s32.totalorder %s415_s6, %s652_s7  ;;  %p658_p4 = scmp.lt.s32.totalorder %s652_s7, %s652_s7 }
  0x2a   :  { %558 = vmatpush3.bf16.msra.mxu0 %v555_v3  ;;  %595 = vmatpush3.bf16.msra.mxu1 %v555_v3  ;;  %v567_v13 = vpack.c.bf16 %v79_v12, %v78_v11  ;;  %v80_v14 = vld [vmem:[#allocation5 + $0x40] sm:$0xff]  ;;  %v82_v17 = vld [vmem:[#allocation5 + $0x50] sm:$0xff]  ;;  %v83_v18 = vld [vmem:[#allocation5 + $0x58] sm:$0xff] }
  0x2b   :  { %560 = vmatprep.subr.bf16.mxu0 %v559_v5  ;;  %588 = vmatprep.subr.bf16.mxu1 %v559_v5  ;;  %v571_v16 = vpack.c.bf16 %v81_v15, %v80_v14  ;;  %v575_v19 = vpack.c.bf16 %v83_v18, %v82_v17  ;;  %v84_v20 = vld [vmem:[#allocation5 + $0x60] sm:$0xff]  ;;  %v85_v21 = vld [vmem:[#allocation5 + $0x68] sm:$0xff]  ;;  %v86_v23 = vld [vmem:[#allocation5 + $0x70] sm:$0xff]  ;;  %p659_p5 = por %p658_p4, %p657_p3 }
  0x2c   :  { %507 = vmatprep.mubr.f32.mxu0 %v730_v9  ;;  %531 = vmatprep.mubr.f32.mxu1 %v732_v10  ;;  %v579_v22 = vpack.c.bf16 %v85_v21, %v84_v20  ;;  %v87_v24 = vld [vmem:[#allocation5 + $0x78] sm:$0xff]  ;;  %v736_v26 = vld [vmem:[#allocation2 + $0x8] sm:$0xff]  ;;  %v740_v28 = vld [vmem:[#allocation2 + $0x10] sm:$0xff] }
  0x2d   :  { %v583_v25 = vpack.c.bf16 %v87_v24, %v86_v23  ;;  %v738_v27 = vld [vmem:[#allocation2 + $0x88] sm:$0xff]  ;;  %v742_v29 = vld [vmem:[#allocation2 + $0x90] sm:$0xff]  ;;  %v748_v30 = vld [vmem:[#allocation2 + $0x18] sm:$0xff]  ;;  %p660_p6 = pnand %p659_p5, %p653_p2 }
  0x2e   :  { %562 = vmatpush3.bf16.msra.mxu0 %v559_v5  ;;  %596 = vmatpush3.bf16.msra.mxu1 %v559_v5  ;;  %v750_v31 = vld [vmem:[#allocation2 + $0x98] sm:$0xff]  ;;  %v752_v32 = vld [vmem:[#allocation2 + $0x20] sm:$0xff]  ;;  %v760_v34 = vld [vmem:[#allocation2 + $0x28] sm:$0xff] }
  0x2f   :  { %564 = vmatprep.subr.bf16.mxu0 %v563_v8  ;;  %589 = vmatprep.subr.bf16.mxu1 %v563_v8  ;;  %v754_v33 = vld [vmem:[#allocation2 + $0xa0] sm:$0xff]  ;;  %v762_v35 = vld [vmem:[#allocation2 + $0xa8] sm:$0xff]  ;;  %v764_v36 = vld [vmem:[#allocation2 + $0x30] sm:$0xff] }
  0x30   :  { %v766_v37 = vld [vmem:[#allocation2 + $0xb0] sm:$0xff]  ;;  %v772_v38 = vld [vmem:[#allocation2 + $0x38] sm:$0xff]  ;;  %v776_v40 = vld [vmem:[#allocation2 + $0x40] sm:$0xff] }
  0x31   :  { %v774_v39 = vld [vmem:[#allocation2 + $0xb8] sm:$0xff]  ;;  %v778_v41 = vld [vmem:[#allocation2 + $0xc0] sm:$0xff]  ;;  %v784_v42 = vld [vmem:[#allocation2 + $0x48] sm:$0xff] }
  0x32   :  { %566 = vmatpush3.bf16.msra.mxu0 %v563_v8  ;;  %597 = vmatpush3.bf16.msra.mxu1 %v563_v8  ;;  %v786_v43 = vld [vmem:[#allocation2 + $0xc8] sm:$0xff]  ;;  %v788_v44 = vld [vmem:[#allocation2 + $0x50] sm:$0xff]  ;;  %v796_v46 = vld [vmem:[#allocation2 + $0x58] sm:$0xff] }
  0x33   :  { %568 = vmatprep.subr.bf16.mxu0 %v567_v13  ;;  %590 = vmatprep.subr.bf16.mxu1 %v567_v13  ;;  %v790_v45 = vld [vmem:[#allocation2 + $0xd0] sm:$0xff]  ;;  %v798_v47 = vld [vmem:[#allocation2 + $0xd8] sm:$0xff]  ;;  %v800_v48 = vld [vmem:[#allocation2 + $0x60] sm:$0xff] }
  0x34   :  { %v802_v49 = vld [vmem:[#allocation2 + $0xe0] sm:$0xff]  ;;  %v808_v50 = vld [vmem:[#allocation2 + $0x68] sm:$0xff]  ;;  %v812_v52 = vld [vmem:[#allocation2 + $0x70] sm:$0xff] }
  0x35   :  { %v810_v51 = vld [vmem:[#allocation2 + $0xe8] sm:$0xff]  ;;  %v814_v53 = vld [vmem:[#allocation2 + $0xf0] sm:$0xff]  ;;  %v820_v54 = vld [vmem:[#allocation2 + $0x78] sm:$0xff] }
  0x36   :  { %570 = vmatpush3.bf16.msra.mxu0 %v567_v13  ;;  %598 = vmatpush3.bf16.msra.mxu1 %v567_v13  ;;  %v822_v55 = vld [vmem:[#allocation2 + $0xf8] sm:$0xff] }
  0x37   :  { %572 = vmatprep.subr.bf16.mxu0 %v571_v16  ;;  %591 = vmatprep.subr.bf16.mxu1 %v571_v16 }
  0x3a   :  { %574 = vmatpush3.bf16.msra.mxu0 %v571_v16  ;;  %599 = vmatpush3.bf16.msra.mxu1 %v571_v16 }
  0x3b   :  { %576 = vmatprep.subr.bf16.mxu0 %v575_v19  ;;  %592 = vmatprep.subr.bf16.mxu1 %v575_v19 }
  0x3e   :  { %578 = vmatpush3.bf16.msra.mxu0 %v575_v19  ;;  %600 = vmatpush3.bf16.msra.mxu1 %v575_v19 }
  0x3f   :  { %580 = vmatprep.subr.bf16.mxu0 %v579_v22  ;;  %593 = vmatprep.subr.bf16.mxu1 %v579_v22 }
  0x42   :  { %582 = vmatpush3.bf16.msra.mxu0 %v579_v22  ;;  %601 = vmatpush3.bf16.msra.mxu1 %v579_v22 }
  0x43   :  { %584 = vmatprep.subr.bf16.mxu0 %v583_v25  ;;  %594 = vmatprep.subr.bf16.mxu1 %v583_v25 }
  0x46   :  { %586 = vmatpush3.bf16.msra.mxu0 %v583_v25  ;;  %602 = vmatpush3.bf16.msra.mxu1 %v583_v25 }
  0x49   :  { %508 = vmatmul.mubr.f32.vlgmr.msra.gmra.mrb[0].mxu0 %v736_v26  ;;  %532 = vmatmul.mubr.f32.vlgmr.msra.gmra.mrb[0].mxu1 %v738_v27 }
  0x4a   :  { %510 = vmatprep.mubr.f32.mxu0 %v740_v28  ;;  %534 = vmatprep.mubr.f32.mxu1 %v742_v29 }
  0x4d   :  { %511 = vmatmul.mubr.f32.gmra.mrb[2].mxu0 %v748_v30  ;;  %535 = vmatmul.mubr.f32.gmra.mrb[2].mxu1 %v750_v31 }
  0x4e   :  { %513 = vmatprep.mubr.f32.mxu0 %v752_v32  ;;  %537 = vmatprep.mubr.f32.mxu1 %v754_v33 }
  0x51   :  { %514 = vmatmul.mubr.f32.gmra.mrb[4].mxu0 %v760_v34  ;;  %538 = vmatmul.mubr.f32.gmra.mrb[4].mxu1 %v762_v35 }
  0x52   :  { %516 = vmatprep.mubr.f32.mxu0 %v764_v36  ;;  %540 = vmatprep.mubr.f32.mxu1 %v766_v37 }
  0x55   :  { %517 = vmatmul.mubr.f32.gmra.mrb[6].mxu0 %v772_v38  ;;  %541 = vmatmul.mubr.f32.gmra.mrb[6].mxu1 %v774_v39 }
  0x56   :  { %519 = vmatprep.mubr.f32.mxu0 %v776_v40  ;;  %543 = vmatprep.mubr.f32.mxu1 %v778_v41 }
  0x59   :  { %520 = vmatmul.mubr.f32.gmra.mrb[8].mxu0 %v784_v42  ;;  %544 = vmatmul.mubr.f32.gmra.mrb[8].mxu1 %v786_v43 }
  0x5a   :  { %522 = vmatprep.mubr.f32.mxu0 %v788_v44  ;;  %546 = vmatprep.mubr.f32.mxu1 %v790_v45 }
  0x5d   :  { %523 = vmatmul.mubr.f32.gmra.mrb[10].mxu0 %v796_v46  ;;  %547 = vmatmul.mubr.f32.gmra.mrb[10].mxu1 %v798_v47 }
  0x5e   :  { %525 = vmatprep.mubr.f32.mxu0 %v800_v48  ;;  %549 = vmatprep.mubr.f32.mxu1 %v802_v49 }
  0x61   :  { %526 = vmatmul.mubr.f32.gmra.mrb[12].mxu0 %v808_v50  ;;  %550 = vmatmul.mubr.f32.gmra.mrb[12].mxu1 %v810_v51 }
  0x62   :  { %528 = vmatprep.mubr.f32.mxu0 %v812_v52  ;;  %552 = vmatprep.mubr.f32.mxu1 %v814_v53 }
  0x65   :  { %529 = vmatmul.mubr.f32.gmra.mrb[14].mxu0 %v820_v54  ;;  %553 = vmatmul.mubr.f32.gmra.mrb[14].mxu1 %v822_v55 }
 0x11c   :  { %v509_v56 = vpop.f32.mrb[0].mxu0  ;;  %v533_v57 = vpop.f32.mrb[0].mxu1 }
 0x11d   :  { %v314_v58 = vsub.f32 %v736_v26, %v509_v56  ;;  %v330_v59 = vsub.f32 %v738_v27, %v533_v57  ;;  %v154_v60 = vpop.f32.mrb[1].mxu0  ;;  %v234_v61 = vpop.f32.mrb[1].mxu1 }
 0x11e   :  { %v313_v62 = vsub.f32 %v730_v9, %v154_v60  ;;  %v329_v63 = vsub.f32 %v732_v10, %v234_v61 }
 0x11f   :  { %v346_v0 = vadd.f32 %v509_v56, %v314_v58  ;;  %v362_v1 = vadd.f32 %v533_v57, %v330_v59 }
 0x120   :  { %v345_v2 = vadd.f32 %v313_v62, %v154_v60  ;;  %v361_v3 = vadd.f32 %v329_v63, %v234_v61  ;;  %v512_v4 = vpop.f32.mrb[2].mxu0  ;;  %v536_v5 = vpop.f32.mrb[2].mxu1 }
 0x121   :  { %378 = vst [vmem:[#allocation7 + $0x8] sm:$0xff] %v346_v0  ;;  %394 = vst [vmem:[#allocation7 + $0x88] sm:$0xff] %v362_v1  ;;  %v316_v6 = vsub.f32 %v748_v30, %v512_v4  ;;  %v332_v7 = vsub.f32 %v750_v31, %v536_v5  ;;  %v164_v8 = vpop.f32.mrb[3].mxu0  ;;  %v244_v11 = vpop.f32.mrb[3].mxu1 }
 0x122   :  { %377 = vst [vmem:[#allocation7] sm:$0xff] %v345_v2  ;;  %393 = vst [vmem:[#allocation7 + $0x80] sm:$0xff] %v361_v3  ;;  %v315_v9 = vsub.f32 %v740_v28, %v164_v8  ;;  %v331_v10 = vsub.f32 %v742_v29, %v244_v11 }
 0x123   :  { %v348_v12 = vadd.f32 %v512_v4, %v316_v6  ;;  %v364_v13 = vadd.f32 %v536_v5, %v332_v7 }
 0x124   :  { %v347_v14 = vadd.f32 %v315_v9, %v164_v8  ;;  %v363_v15 = vadd.f32 %v331_v10, %v244_v11  ;;  %v515_v16 = vpop.f32.mrb[4].mxu0  ;;  %v539_v17 = vpop.f32.mrb[4].mxu1 }
 0x125   :  { %380 = vst [vmem:[#allocation7 + $0x18] sm:$0xff] %v348_v12  ;;  %396 = vst [vmem:[#allocation7 + $0x98] sm:$0xff] %v364_v13  ;;  %v318_v18 = vsub.f32 %v760_v34, %v515_v16  ;;  %v334_v19 = vsub.f32 %v762_v35, %v539_v17  ;;  %v174_v20 = vpop.f32.mrb[5].mxu0  ;;  %v254_v21 = vpop.f32.mrb[5].mxu1 }
 0x126   :  { %379 = vst [vmem:[#allocation7 + $0x10] sm:$0xff] %v347_v14  ;;  %395 = vst [vmem:[#allocation7 + $0x90] sm:$0xff] %v363_v15  ;;  %v317_v22 = vsub.f32 %v752_v32, %v174_v20  ;;  %v333_v23 = vsub.f32 %v754_v33, %v254_v21 }
 0x127   :  { %v350_v24 = vadd.f32 %v515_v16, %v318_v18  ;;  %v366_v25 = vadd.f32 %v539_v17, %v334_v19 }
 0x128   :  { %v349_v26 = vadd.f32 %v317_v22, %v174_v20  ;;  %v365_v27 = vadd.f32 %v333_v23, %v254_v21  ;;  %v518_v28 = vpop.f32.mrb[6].mxu0  ;;  %v542_v29 = vpop.f32.mrb[6].mxu1 }
 0x129   :  { %382 = vst [vmem:[#allocation7 + $0x28] sm:$0xff] %v350_v24  ;;  %398 = vst [vmem:[#allocation7 + $0xa8] sm:$0xff] %v366_v25  ;;  %v320_v30 = vsub.f32 %v772_v38, %v518_v28  ;;  %v336_v31 = vsub.f32 %v774_v39, %v542_v29  ;;  %v184_v34 = vpop.f32.mrb[7].mxu0  ;;  %v264_v35 = vpop.f32.mrb[7].mxu1 }
 0x12a   :  { %381 = vst [vmem:[#allocation7 + $0x20] sm:$0xff] %v349_v26  ;;  %397 = vst [vmem:[#allocation7 + $0xa0] sm:$0xff] %v365_v27  ;;  %v319_v32 = vsub.f32 %v764_v36, %v184_v34  ;;  %v335_v33 = vsub.f32 %v766_v37, %v264_v35 }
 0x12b   :  { %v352_v56 = vadd.f32 %v518_v28, %v320_v30  ;;  %v368_v57 = vadd.f32 %v542_v29, %v336_v31 }
 0x12c   :  { %v351_v58 = vadd.f32 %v319_v32, %v184_v34  ;;  %v367_v59 = vadd.f32 %v335_v33, %v264_v35  ;;  %v521_v60 = vpop.f32.mrb[8].mxu0  ;;  %v545_v61 = vpop.f32.mrb[8].mxu1 }
 0x12d   :  { %384 = vst [vmem:[#allocation7 + $0x38] sm:$0xff] %v352_v56  ;;  %400 = vst [vmem:[#allocation7 + $0xb8] sm:$0xff] %v368_v57  ;;  %v322_v38 = vsub.f32 %v784_v42, %v521_v60  ;;  %v338_v39 = vsub.f32 %v786_v43, %v545_v61  ;;  %v194_v62 = vpop.f32.mrb[9].mxu0  ;;  %v274_v63 = vpop.f32.mrb[9].mxu1 }
 0x12e   :  { %383 = vst [vmem:[#allocation7 + $0x30] sm:$0xff] %v351_v58  ;;  %399 = vst [vmem:[#allocation7 + $0xb0] sm:$0xff] %v367_v59  ;;  %v321_v36 = vsub.f32 %v776_v40, %v194_v62  ;;  %v337_v37 = vsub.f32 %v778_v41, %v274_v63 }
 0x12f   :  { %v354_v0 = vadd.f32 %v521_v60, %v322_v38  ;;  %v370_v1 = vadd.f32 %v545_v61, %v338_v39 }
 0x130   :  { %v353_v2 = vadd.f32 %v321_v36, %v194_v62  ;;  %v369_v3 = vadd.f32 %v337_v37, %v274_v63  ;;  %v524_v4 = vpop.f32.mrb[10].mxu0  ;;  %v548_v5 = vpop.f32.mrb[10].mxu1 }
 0x131   :  { %386 = vst [vmem:[#allocation7 + $0x48] sm:$0xff] %v354_v0  ;;  %402 = vst [vmem:[#allocation7 + $0xc8] sm:$0xff] %v370_v1  ;;  %v324_v42 = vsub.f32 %v796_v46, %v524_v4  ;;  %v340_v43 = vsub.f32 %v798_v47, %v548_v5  ;;  %v204_v6 = vpop.f32.mrb[11].mxu0  ;;  %v284_v7 = vpop.f32.mrb[11].mxu1 }
 0x132   :  { %385 = vst [vmem:[#allocation7 + $0x40] sm:$0xff] %v353_v2  ;;  %401 = vst [vmem:[#allocation7 + $0xc0] sm:$0xff] %v369_v3  ;;  %v323_v40 = vsub.f32 %v788_v44, %v204_v6  ;;  %v339_v41 = vsub.f32 %v790_v45, %v284_v7 }
 0x133   :  { %v356_v8 = vadd.f32 %v524_v4, %v324_v42  ;;  %v372_v11 = vadd.f32 %v548_v5, %v340_v43 }
 0x134   :  { %v355_v9 = vadd.f32 %v323_v40, %v204_v6  ;;  %v371_v10 = vadd.f32 %v339_v41, %v284_v7  ;;  %v527_v12 = vpop.f32.mrb[12].mxu0  ;;  %v551_v13 = vpop.f32.mrb[12].mxu1 }
 0x135   :  { %388 = vst [vmem:[#allocation7 + $0x58] sm:$0xff] %v356_v8  ;;  %404 = vst [vmem:[#allocation7 + $0xd8] sm:$0xff] %v372_v11  ;;  %v326_v46 = vsub.f32 %v808_v50, %v527_v12  ;;  %v342_v47 = vsub.f32 %v810_v51, %v551_v13  ;;  %v214_v14 = vpop.f32.mrb[13].mxu0  ;;  %v294_v15 = vpop.f32.mrb[13].mxu1 }
 0x136   :  { %387 = vst [vmem:[#allocation7 + $0x50] sm:$0xff] %v355_v9  ;;  %403 = vst [vmem:[#allocation7 + $0xd0] sm:$0xff] %v371_v10  ;;  %v325_v44 = vsub.f32 %v800_v48, %v214_v14  ;;  %v341_v45 = vsub.f32 %v802_v49, %v294_v15 }
 0x137   :  { %v358_v16 = vadd.f32 %v527_v12, %v326_v46  ;;  %v374_v17 = vadd.f32 %v551_v13, %v342_v47 }
 0x138   :  { %v357_v18 = vadd.f32 %v325_v44, %v214_v14  ;;  %v373_v19 = vadd.f32 %v341_v45, %v294_v15  ;;  %v530_v20 = vpop.f32.mrb[14].mxu0  ;;  %v554_v21 = vpop.f32.mrb[14].mxu1 }
 0x139   :  { %390 = vst [vmem:[#allocation7 + $0x68] sm:$0xff] %v358_v16  ;;  %406 = vst [vmem:[#allocation7 + $0xe8] sm:$0xff] %v374_v17  ;;  %v328_v50 = vsub.f32 %v820_v54, %v530_v20  ;;  %v344_v51 = vsub.f32 %v822_v55, %v554_v21  ;;  %v224_v22 = vpop.f32.mrb[15].mxu0  ;;  %v304_v23 = vpop.f32.mrb[15].mxu1 }
 0x13a   :  { %389 = vst [vmem:[#allocation7 + $0x60] sm:$0xff] %v357_v18  ;;  %405 = vst [vmem:[#allocation7 + $0xe0] sm:$0xff] %v373_v19  ;;  %v327_v48 = vsub.f32 %v812_v52, %v224_v22  ;;  %v343_v49 = vsub.f32 %v814_v53, %v304_v23 }
 0x13b   :  { %v360_v24 = vadd.f32 %v530_v20, %v328_v50  ;;  %v376_v25 = vadd.f32 %v554_v21, %v344_v51 }
 0x13c   :  { %v359_v26 = vadd.f32 %v327_v48, %v224_v22  ;;  %v375_v27 = vadd.f32 %v343_v49, %v304_v23 }
 0x13d   :  { %392 = vst [vmem:[#allocation7 + $0x78] sm:$0xff] %v360_v24  ;;  %408 = vst [vmem:[#allocation7 + $0xf8] sm:$0xff] %v376_v25 }
 0x13e   :  { %391 = vst [vmem:[#allocation7 + $0x70] sm:$0xff] %v359_v26  ;;  %407 = vst [vmem:[#allocation7 + $0xf0] sm:$0xff] %v375_v27 }
 0x13f   :  { %663 = shalt.err (!%p660_p6)
}
 0x140   :  { %s664_s10 = scalar_lea.hbm %s875_s2, 4096 }
 0x141   :  { %p665_p7 = scmp.ne.s32.totalorder %s875_s2, %s664_s10  ;;  %p668_p8 = scmp.lt.u32.totalorder %s664_s10, %s875_s2 }
 0x143   :  { %p670_p9 = pnand %p668_p8, %p665_p7 }
 0x145   :  { %673 = shalt.err (!%p670_p9)
}
 0x146   :  { %420 = dma.vmem_to_hbm [thread:$0]  %s415_s6, 4096, %s875_s2, [#allocation4], %s681_s19, %s681_s19, %s682_s20  }
 0x147   :  { %678 = dma.done.wait [#allocation4], 4096  }
 0x148   :  { %679 = vsyncadd [#allocation4], 4294963200 }
 0x149   :  { %424 = vsyncpa [#allocation3], 1 }
 0x14a   :  { %425 = vsyncpa [#allocation6], 1 }
 0x14b   :  { %426 = vsyncpa [#allocation4], 1 }

</bundles_post_ra>
